<compile_context>
chip_gen: v6e
topology: v6e:2x2x1
jax: 0.10.0
libtpu: 0.0.40
codegen_flags: <defaults>
</compile_context>

<pallas_src>
import functools

import jax
import jax.numpy as jnp
from jax.experimental import pallas as pl
from jax.experimental.pallas import tpu as pltpu

_LANE = 128
_MAX_TP = 512  # pixel-row tile target (amortizes ~0.35us per grid step)


def _round_up(x, m):
    return (x + m - 1) // m * m


def _row_spec(tp, c):
    return pl.BlockSpec((tp, c), lambda i: (i, 0))


def _full_spec(r, c):
    return pl.BlockSpec((r, c), lambda i: (0, 0))


def _project(x_ref, w1_ref, b1_ref, w2_ref, b2_ref, *, normalize, compute_dtype):
    """Conv1x1 (+folded eval-BN) -> ReLU -> Conv1x1 -> optional L2-normalize. f32 out."""
    h = jnp.dot(x_ref[...], w1_ref[...], preferred_element_type=jnp.float32)
    h = jnp.maximum(h + b1_ref[...], 0.0)                # folded conv-bias + BN affine, ReLU
    z = jnp.dot(h.astype(compute_dtype), w2_ref[...],
                preferred_element_type=jnp.float32) + b2_ref[...]
    if normalize:
        ss = jnp.sum(z * z, axis=-1, keepdims=True)
        # == z / max(||z||_2, 1e-12)  (F.normalize); rsqrt goes to the EUP slot.
        z = z * jax.lax.rsqrt(jnp.maximum(ss, 1e-24))
    return z


def _proj_scores_kernel(x_ref, w1_ref, b1_ref, w2_ref, b2_ref, wp_ref,
                        proj_ref, scores_ref, *, normalize, compute_dtype):
    """Fused projection + all prototype heads (concatenated along K)."""
    z = _project(x_ref, w1_ref, b1_ref, w2_ref, b2_ref,
                 normalize=normalize, compute_dtype=compute_dtype)
    proj_ref[...] = z.astype(proj_ref.dtype)
    scores_ref[...] = jnp.dot(z.astype(compute_dtype), wp_ref[...],
                              preferred_element_type=jnp.float32).astype(scores_ref.dtype)


def _proj_kernel(x_ref, w1_ref, b1_ref, w2_ref, b2_ref, proj_ref,
                 *, normalize, compute_dtype):
    z = _project(x_ref, w1_ref, b1_ref, w2_ref, b2_ref,
                 normalize=normalize, compute_dtype=compute_dtype)
    proj_ref[...] = z.astype(proj_ref.dtype)


def _vmem_limit_bytes(tp, cp, hp, dp, kp, itemsize):
    # Resident weights (double-buffered BlockSpecs) + pipelined I/O tiles + slack.
    weights = (cp * hp + hp * dp + dp * kp) * itemsize + (hp + dp) * 4
    io = tp * (cp * itemsize + (dp + kp) * 4)
    need = 2 * (weights + io) + (4 << 20)
    # Raise above the small defaults but keep headroom for v7x's 64 MiB physical VMEM.
    return int(min(max(need, 32 << 20), 64 << 20))


def prepare_params(params, bn_eps=1e-5, compute_dtype=jnp.bfloat16):
    """Fold eval-mode BN, concat+transpose prototypes, pad channel dims to 128, cast."""
    w1 = jnp.asarray(params["w1"], jnp.float32)          # (C, hidden)
    b1 = jnp.asarray(params["b1"], jnp.float32)
    w2 = jnp.asarray(params["w2"], jnp.float32)          # (hidden, D)
    b2 = jnp.asarray(params["b2"], jnp.float32)
    bn_scale = params["gamma"] / jnp.sqrt(params["run_var"] + bn_eps)
    bn_shift = params["beta"] - params["run_mean"] * bn_scale
    w1f = w1 * bn_scale[None, :]                         # fold BN scale into columns
    b1f = b1 * bn_scale + bn_shift                       # fold conv bias + BN shift

    C, hidden = w1.shape
    D = w2.shape[1]
    Cp = _round_up(C, _LANE)
    Hp = _round_up(hidden, _LANE)
    Dp = _round_up(D, _LANE)

    ks = tuple(int(wk.shape[0]) for wk in params["prototypes"])
    Ktot = sum(ks)
    if Ktot > 0:
        wproto = jnp.concatenate(
            [jnp.asarray(wk, jnp.float32).T for wk in params["prototypes"]], axis=1)
        Kp = _round_up(Ktot, _LANE)
        wproto = jnp.pad(wproto, ((0, Dp - D), (0, Kp - Ktot))).astype(compute_dtype)
    else:
        Kp = 0
        wproto = None

    return dict(
        w1=jnp.pad(w1f, ((0, Cp - C), (0, Hp - hidden))).astype(compute_dtype),
        b1=jnp.pad(b1f, (0, Hp - hidden)).reshape(1, Hp),                    # f32
        w2=jnp.pad(w2, ((0, Hp - hidden), (0, Dp - D))).astype(compute_dtype),
        b2=jnp.pad(b2, (0, Dp - D)).reshape(1, Dp),                          # f32
        wproto=wproto,
        ks=ks, C=C, hidden=hidden, D=D, Cp=Cp, Hp=Hp, Dp=Dp, Kp=Kp,
        compute_dtype=compute_dtype,
    )


def dense_swav_head_forward(feat, prep, *, normalize_feats=True,
                            output_projections=False, return_embeddings=True,
                            comp_score_output=True):
    """feat: (N, C, H, W) float32 (NCHW, matching the PyTorch module)."""
    N, C, H, W = feat.shape
    assert C == prep["C"], (C, prep["C"])
    cd = prep["compute_dtype"]
    Cp, Hp, Dp, Kp, D = prep["Cp"], prep["Hp"], prep["Dp"], prep["Kp"], prep["D"]
    itemsize = jnp.dtype(cd).itemsize

    with_scores = (not output_projections) and comp_score_output and Kp > 0

    if output_projections:
        rows = N * H * W
        x = jnp.transpose(feat, (0, 2, 3, 1)).reshape(rows, C)
    else:
        # The module only consumes proj[0] -> project image 0's H*W rows only.
        rows = H * W
        x = jnp.transpose(feat[0], (1, 2, 0)).reshape(rows, C)

    TP = min(_MAX_TP, _round_up(rows, 8))
    Rp = _round_up(rows, TP)
    xp = jnp.pad(x, ((0, Rp - rows), (0, Cp - C))).astype(cd)

    compiler_params = pltpu.CompilerParams(
        dimension_semantics=("parallel",),
        vmem_limit_bytes=_vmem_limit_bytes(TP, Cp, Hp, Dp, Kp if with_scores else 0,
                                           itemsize),
    )
    common_in_specs = [
        _row_spec(TP, Cp),       # x rows
        _full_spec(Cp, Hp),      # w1 (BN folded)
        _full_spec(1, Hp),       # b1 (BN folded)
        _full_spec(Hp, Dp),      # w2
        _full_spec(1, Dp),       # b2
    ]
    grid = (Rp // TP,)

    if with_scores:
        kernel = functools.partial(_proj_scores_kernel,
                                   normalize=normalize_feats, compute_dtype=cd)
        proj_p, scores_p = pl.pallas_call(
            kernel,
            out_shape=(jax.ShapeDtypeStruct((Rp, Dp), jnp.float32),
                       jax.ShapeDtypeStruct((Rp, Kp), jnp.float32)),
            grid_spec=pltpu.PrefetchScalarGridSpec(
                num_scalar_prefetch=0, grid=grid,
                in_specs=common_in_specs + [_full_spec(Dp, Kp)],
                out_specs=(_row_spec(TP, Dp), _row_spec(TP, Kp)),
            ),
            compiler_params=compiler_params,
        )(xp, prep["w1"], prep["b1"], prep["w2"], prep["b2"], prep["wproto"])
    else:
        kernel = functools.partial(_proj_kernel,
                                   normalize=normalize_feats, compute_dtype=cd)
        proj_p = pl.pallas_call(
            kernel,
            out_shape=jax.ShapeDtypeStruct((Rp, Dp), jnp.float32),
            grid_spec=pltpu.PrefetchScalarGridSpec(
                num_scalar_prefetch=0, grid=grid,
                in_specs=common_in_specs,
                out_specs=_row_spec(TP, Dp),
            ),
            compiler_params=compiler_params,
        )(xp, prep["w1"], prep["b1"], prep["w2"], prep["b2"])

    if output_projections:
        # Return NCHW like the PyTorch module.
        return jnp.transpose(proj_p[:rows, :D].reshape(N, H, W, D), (0, 3, 1, 2))

    # proj[0].reshape(D, -1).T == the H*W rows of the flattened image-0 output.
    proj0 = proj_p[:rows, :D]
    out = []
    if return_embeddings:
        out.append(proj0)
    if with_scores:
        off = 0
        for k in prep["ks"]:
            out.append(scores_p[:rows, off:off + k])
            off += k
    return out


# ----------------------------- test harness ---------------------------------

def init_params(key, dims, num_clusters):
    """Deterministic synthetic parameters matching the module's shapes."""
    c_in, hidden, d = dims
    keys = jax.random.split(key, 8 + len(num_clusters))
    w1 = jax.random.normal(keys[0], (c_in, hidden), jnp.float32) / jnp.sqrt(float(c_in))
    b1 = 0.01 * jax.random.normal(keys[1], (hidden,), jnp.float32)
    w2 = jax.random.normal(keys[2], (hidden, d), jnp.float32) / jnp.sqrt(float(hidden))
    b2 = 0.01 * jax.random.normal(keys[3], (d,), jnp.float32)
    # Non-trivial eval-mode BatchNorm stats so the BN fold is actually exercised.
    gamma = 1.0 + 0.1 * jax.random.normal(keys[4], (hidden,), jnp.float32)
    beta = 0.1 * jax.random.normal(keys[5], (hidden,), jnp.float32)
    run_mean = 0.1 * jax.random.normal(keys[6], (hidden,), jnp.float32)
    run_var = 1.0 + 0.1 * jnp.abs(jax.random.normal(keys[7], (hidden,), jnp.float32))
    protos = [
        jax.random.normal(keys[8 + i], (k, d), jnp.float32) / jnp.sqrt(float(d))
        for i, k in enumerate(num_clusters)
    ]
    return dict(w1=w1, b1=b1, gamma=gamma, beta=beta, run_mean=run_mean,
                run_var=run_var, w2=w2, b2=b2, prototypes=protos)


def _ref_project(feat, params, bn_eps=1e-5, normalize=True):
    """Pure-JAX f32 reference of the projection head (module semantics)."""
    N, C, H, W = feat.shape
    x = jnp.transpose(feat, (0, 2, 3, 1)).reshape(-1, C)
    h = x @ params["w1"] + params["b1"]
    scale = params["gamma"] / jnp.sqrt(params["run_var"] + bn_eps)
    shift = params["beta"] - params["run_mean"] * scale
    h = jnp.maximum(h * scale + shift, 0.0)
    z = h @ params["w2"] + params["b2"]
    if normalize:
        z = z / jnp.maximum(jnp.linalg.norm(z, axis=-1, keepdims=True), 1e-12)
    return z


def _reference(feat, params):
    N, C, H, W = feat.shape
    z = _ref_project(feat, params)
    proj0 = z[: H * W]
    out = [proj0]
    for wk in params["prototypes"]:
        out.append(proj0 @ wk.T)
    return out


if __name__ == "__main__":
    key = jax.random.PRNGKey(0)
    k_feat, k_par = jax.random.split(key)

    # Small shapes consistent with the module: dims=[4, 32, 16], 2 prototype heads.
    N, C, H, W = 2, 4, 16, 16
    dims = [C, 32, 16]
    num_clusters = [8, 12]

    feat = jax.random.normal(k_feat, (N, C, H, W), jnp.float32)
    params = init_params(k_par, dims, num_clusters)
    refs = _reference(feat, params)

    def check(outs, rtol, atol):
        assert len(outs) == len(refs) == 1 + len(num_clusters)
        for o, r in zip(outs, refs):
            assert o.shape == r.shape, (o.shape, r.shape)
            assert jnp.allclose(o, r, rtol=rtol, atol=atol), float(jnp.max(jnp.abs(o - r)))

    # f32 compute path: tight check against the module-semantics reference.
    prep32 = prepare_params(params, compute_dtype=jnp.float32)
    outs32 = jax.block_until_ready(dense_swav_head_forward(feat, prep32))
    check(outs32, rtol=1e-3, atol=1e-3)

    # bf16 MXU-operand path (the fast config): looser tolerance for bf16 rounding.
    prep16 = prepare_params(params, compute_dtype=jnp.bfloat16)
    outs16 = jax.block_until_ready(dense_swav_head_forward(feat, prep16))
    check(outs16, rtol=5e-2, atol=5e-2)

    # output_projections=True path (full batch, NCHW like the module).
    proj_nchw = jax.block_until_ready(
        dense_swav_head_forward(feat, prep32, output_projections=True))
    ref_nchw = jnp.transpose(
        _ref_project(feat, params).reshape(N, H, W, dims[-1]), (0, 3, 1, 2))
    assert proj_nchw.shape == ref_nchw.shape, (proj_nchw.shape, ref_nchw.shape)
    assert jnp.allclose(proj_nchw, ref_nchw, rtol=1e-3, atol=1e-3), \
        float(jnp.max(jnp.abs(proj_nchw - ref_nchw)))

    print("KERNEL_OK")
</pallas_src>

<mosaic_0001>
module attributes {stable_mosaic.version = 11 : i64} {
  func.func @_proj_scores_kernel(%arg0: i32, %arg1: memref<256x128xf32, #tpu.memory_space<vmem>>, %arg2: memref<128x128xf32, #tpu.memory_space<vmem>>, %arg3: memref<1x128xf32, #tpu.memory_space<vmem>>, %arg4: memref<128x128xf32, #tpu.memory_space<vmem>>, %arg5: memref<1x128xf32, #tpu.memory_space<vmem>>, %arg6: memref<128x128xf32, #tpu.memory_space<vmem>>, %arg7: memref<256x128xf32, #tpu.memory_space<vmem>>, %arg8: memref<256x128xf32, #tpu.memory_space<vmem>>) attributes {dimension_semantics = [#tpu.dimension_semantics<parallel>], iteration_bounds = array<i64: 1>, scalar_prefetch = 0 : i64, scratch_operands = 0 : i64, tpu.core_type = #tpu.core_type<tc>, window_params = [{transform_indices = @transform_0, window_bounds = array<i64: 256, 128>}, {pipeline_mode = #tpu.pipeline_mode<synchronous>, transform_indices = @transform_1, window_bounds = array<i64: 128, 128>}, {pipeline_mode = #tpu.pipeline_mode<synchronous>, transform_indices = @transform_2, window_bounds = array<i64: 1, 128>}, {pipeline_mode = #tpu.pipeline_mode<synchronous>, transform_indices = @transform_3, window_bounds = array<i64: 128, 128>}, {pipeline_mode = #tpu.pipeline_mode<synchronous>, transform_indices = @transform_4, window_bounds = array<i64: 1, 128>}, {pipeline_mode = #tpu.pipeline_mode<synchronous>, transform_indices = @transform_5, window_bounds = array<i64: 128, 128>}, {transform_indices = @transform_6, window_bounds = array<i64: 256, 128>}, {transform_indices = @transform_7, window_bounds = array<i64: 256, 128>}]} {
    %c0 = arith.constant 0 : index
    %c0_0 = arith.constant 0 : index
    %0 = vector.load %arg1[%c0, %c0_0] : memref<256x128xf32, #tpu.memory_space<vmem>>, vector<256x128xf32>
    %c0_1 = arith.constant 0 : index
    %c0_2 = arith.constant 0 : index
    %1 = vector.load %arg2[%c0_1, %c0_2] : memref<128x128xf32, #tpu.memory_space<vmem>>, vector<128x128xf32>
    %cst = arith.constant dense<0.000000e+00> : vector<256x128xf32>
    %2 = tpu.matmul %0, %1, %cst {dimension_numbers = #tpu.dot_dimension_numbers<[1], [0], [0], [1], [0, 0, 1, 1], [], []>} : vector<256x128xf32>, vector<128x128xf32>, vector<256x128xf32> -> vector<256x128xf32>
    %c0_3 = arith.constant 0 : index
    %c0_4 = arith.constant 0 : index
    %3 = vector.load %arg3[%c0_3, %c0_4] : memref<1x128xf32, #tpu.memory_space<vmem>>, vector<1x128xf32>
    %4 = vector.broadcast %3 : vector<1x128xf32> to vector<256x128xf32>
    %5 = arith.addf %2, %4 : vector<256x128xf32>
    %cst_5 = arith.constant 0.000000e+00 : f32
    %6 = vector.broadcast %cst_5 : f32 to vector<256x128xf32>
    %7 = arith.maximumf %5, %6 : vector<256x128xf32>
    %c0_6 = arith.constant 0 : index
    %c0_7 = arith.constant 0 : index
    %8 = vector.load %arg4[%c0_6, %c0_7] : memref<128x128xf32, #tpu.memory_space<vmem>>, vector<128x128xf32>
    %cst_8 = arith.constant dense<0.000000e+00> : vector<256x128xf32>
    %9 = tpu.matmul %7, %8, %cst_8 {dimension_numbers = #tpu.dot_dimension_numbers<[1], [0], [0], [1], [0, 0, 1, 1], [], []>} : vector<256x128xf32>, vector<128x128xf32>, vector<256x128xf32> -> vector<256x128xf32>
    %c0_9 = arith.constant 0 : index
    %c0_10 = arith.constant 0 : index
    %10 = vector.load %arg5[%c0_9, %c0_10] : memref<1x128xf32, #tpu.memory_space<vmem>>, vector<1x128xf32>
    %11 = vector.broadcast %10 : vector<1x128xf32> to vector<256x128xf32>
    %12 = arith.addf %9, %11 : vector<256x128xf32>
    %13 = arith.mulf %12, %12 : vector<256x128xf32>
    %cst_11 = arith.constant dense<0.000000e+00> : vector<256xf32>
    %14 = vector.multi_reduction <add>, %13, %cst_11 [1] : vector<256x128xf32> to vector<256xf32>
    %15 = vector.shape_cast %14 : vector<256xf32> to vector<256x1xf32>
    %cst_12 = arith.constant 1.000000e-24 : f32
    %16 = vector.broadcast %cst_12 : f32 to vector<256x1xf32>
    %17 = arith.maximumf %15, %16 : vector<256x1xf32>
    %18 = math.rsqrt %17 : vector<256x1xf32>
    %19 = vector.broadcast %18 : vector<256x1xf32> to vector<256x128xf32>
    %20 = arith.mulf %12, %19 : vector<256x128xf32>
    %c0_13 = arith.constant 0 : index
    %c0_14 = arith.constant 0 : index
    %21 = vector.load %arg7[%c0_13, %c0_14] : memref<256x128xf32, #tpu.memory_space<vmem>>, vector<256x128xf32>
    tpu.vector_store %arg7[%c0_13, %c0_14], %20 {strides = array<i32>} : memref<256x128xf32, #tpu.memory_space<vmem>>, vector<256x128xf32>,
    %c0_15 = arith.constant 0 : index
    %c0_16 = arith.constant 0 : index
    %22 = vector.load %arg6[%c0_15, %c0_16] : memref<128x128xf32, #tpu.memory_space<vmem>>, vector<128x128xf32>
    %cst_17 = arith.constant dense<0.000000e+00> : vector<256x128xf32>
    %23 = tpu.matmul %20, %22, %cst_17 {dimension_numbers = #tpu.dot_dimension_numbers<[1], [0], [0], [1], [0, 0, 1, 1], [], []>} : vector<256x128xf32>, vector<128x128xf32>, vector<256x128xf32> -> vector<256x128xf32>
    %c0_18 = arith.constant 0 : index
    %c0_19 = arith.constant 0 : index
    %24 = vector.load %arg8[%c0_18, %c0_19] : memref<256x128xf32, #tpu.memory_space<vmem>>, vector<256x128xf32>
    tpu.vector_store %arg8[%c0_18, %c0_19], %23 {strides = array<i32>} : memref<256x128xf32, #tpu.memory_space<vmem>>, vector<256x128xf32>,
    return
  }
  func.func @transform_0(%arg0: i32) -> (i32, i32) {
    %c0_i32 = arith.constant 0 : i32
    %c0_i32_0 = arith.constant 0 : i32
    return %arg0, %c0_i32 : i32, i32
  }
  func.func @transform_1(%arg0: i32) -> (i32, i32) {
    %c0_i32 = arith.constant 0 : i32
    %c0_i32_0 = arith.constant 0 : i32
    %c0_i32_1 = arith.constant 0 : i32
    return %c0_i32, %c0_i32_0 : i32, i32
  }
  func.func @transform_2(%arg0: i32) -> (i32, i32) {
    %c0_i32 = arith.constant 0 : i32
    %c0_i32_0 = arith.constant 0 : i32
    %c0_i32_1 = arith.constant 0 : i32
    return %c0_i32, %c0_i32_0 : i32, i32
  }
  func.func @transform_3(%arg0: i32) -> (i32, i32) {
    %c0_i32 = arith.constant 0 : i32
    %c0_i32_0 = arith.constant 0 : i32
    %c0_i32_1 = arith.constant 0 : i32
    return %c0_i32, %c0_i32_0 : i32, i32
  }
  func.func @transform_4(%arg0: i32) -> (i32, i32) {
    %c0_i32 = arith.constant 0 : i32
    %c0_i32_0 = arith.constant 0 : i32
    %c0_i32_1 = arith.constant 0 : i32
    return %c0_i32, %c0_i32_0 : i32, i32
  }
  func.func @transform_5(%arg0: i32) -> (i32, i32) {
    %c0_i32 = arith.constant 0 : i32
    %c0_i32_0 = arith.constant 0 : i32
    %c0_i32_1 = arith.constant 0 : i32
    return %c0_i32, %c0_i32_0 : i32, i32
  }
  func.func @transform_6(%arg0: i32) -> (i32, i32) {
    %c0_i32 = arith.constant 0 : i32
    %c0_i32_0 = arith.constant 0 : i32
    return %arg0, %c0_i32 : i32, i32
  }
  func.func @transform_7(%arg0: i32) -> (i32, i32) {
    %c0_i32 = arith.constant 0 : i32
    %c0_i32_0 = arith.constant 0 : i32
    return %arg0, %c0_i32 : i32, i32
  }
}

</mosaic_0001>

<bundles_post_ra>
// kernel: tpu_custom_call.1
= control target key start
LH: loop header
LB: loop body
LE: loop exit
PB: predicated region body
PF: predicated region fallthrough
CT: control target
= control target key end

     0   :  { %13 = vsyncpa [#allocation3], 0  ;;  %s2121_s0 = inlined_call_operand.hbm [shape: f32[256,128], index: 0, kind: input, shape index: {}]   ;;  %s2122_s1 = inlined_call_operand.hbm [shape: f32[128,128], index: 1, kind: input, shape index: {}]   ;;  %s2123_s2 = inlined_call_operand.vmem [shape: f32[1,128], index: 2, kind: input, shape index: {}]   ;;  %s2124_s3 = inlined_call_operand.hbm [shape: f32[128,128], index: 3, kind: input, shape index: {}]   ;;  %s2125_s4 = inlined_call_operand.vmem [shape: f32[1,128], index: 4, kind: input, shape index: {}]   ;;  %s2126_s5 = inlined_call_operand.hbm [shape: f32[128,128], index: 5, kind: input, shape index: {}]   ;;  %s2127_s6 = inlined_call_operand.hbm [shape: f32[256,128], index: 6, kind: output, shape index: {0}]   ;;  %s2128_s7 = inlined_call_operand.hbm [shape: f32[256,128], index: 7, kind: output, shape index: {1}]  }
   0x1   :  { %14 = vsyncpa [#allocation6], 0 }
   0x2   :  { %15 = vsyncpa [#allocation9], 0 }
   0x3   :  { %16 = vsyncpa [#allocation4], 0 }
   0x4   :  { %17 = vsyncpa [#allocation12], 0  ;;  %s1794_s24 = smov [#allocation5]   ;;  %s1795_s26 = smov [#allocation2]  }
   0x5   :  { %s35_s25 = sshll.u32 %s1794_s24, 4  ;;  %s23_s27 = sshll.u32 %s1795_s26, 4  ;;  %s36_s25 = int_to_ptr.vmem [resolvable:$true] %s35_s25  ;;  %s24_s27 = int_to_ptr.vmem [resolvable:$true] %s23_s27 }
   0x6   :  { %s1672_s28 = scalar_lea.vmem %s36_s25, 2048  ;;  %p1677_p1 = scmp.lt.s32.totalorder %s36_s25, %s36_s25 }
   0x7   :  { %p1673_p0 = scmp.ne.s32.totalorder %s36_s25, %s1672_s28  ;;  %p1678_p2 = scmp.lt.s32.totalorder %s1672_s28, %s1672_s28 }
   0x9   :  { %p1679_p3 = por %p1678_p2, %p1677_p1 }
   0xb   :  { %p1680_p4 = pnand %p1679_p3, %p1673_p0 }
   0xd   :  { %1683 = shalt.err (!%p1680_p4)
}
   0xe   :  { %s1796_s29 = smov 128   ;;  %s1797_s30 = smov 8  }
   0xf   :  { %41 = dma.hbm_to_vmem [thread:$0]  %s2122_s1, 2048, %s36_s25, [#allocation6], %s1796_s29, %s1796_s29, %s1797_s30  }
  0x10   :  { %s1692_s10 = scalar_lea.vmem %s24_s27, 4096  ;;  %p1697_p6 = scmp.lt.s32.totalorder %s24_s27, %s24_s27 }
  0x11   :  { %p1693_p5 = scmp.ne.s32.totalorder %s24_s27, %s1692_s10  ;;  %p1698_p7 = scmp.lt.s32.totalorder %s1692_s10, %s1692_s10 }
  0x13   :  { %p1699_p8 = por %p1698_p7, %p1697_p6 }
  0x15   :  { %p1700_p9 = pnand %p1699_p8, %p1693_p5 }
  0x17   :  { %1703 = shalt.err (!%p1700_p9)
}
  0x18   :  { %29 = dma.hbm_to_vmem [thread:$0]  %s2121_s0, 4096, %s24_s27, [#allocation3], %s1796_s29, %s1796_s29, %s1797_s30  }
  0x19   :  { %s1798_s13 = smov [#allocation7]   ;;  %s1799_s15 = smov [#allocation8]  }
  0x1a   :  { %s49_s14 = sshll.u32 %s1798_s13, 4  ;;  %s63_s16 = sshll.u32 %s1799_s15, 4  ;;  %s50_s14 = int_to_ptr.vmem [resolvable:$true] %s49_s14  ;;  %s64_s16 = int_to_ptr.vmem [resolvable:$true] %s63_s16 }
  0x1b   :  { %s1712_s1 = scalar_lea.vmem %s50_s14, 2048  ;;  %p1717_p11 = scmp.lt.s32.totalorder %s50_s14, %s50_s14 }
  0x1c   :  { %p1713_p10 = scmp.ne.s32.totalorder %s50_s14, %s1712_s1  ;;  %p1718_p12 = scmp.lt.s32.totalorder %s1712_s1, %s1712_s1 }
  0x1e   :  { %p1719_p13 = por %p1718_p12, %p1717_p11 }
  0x20   :  { %p1720_p0 = pnand %p1719_p13, %p1713_p10 }
  0x22   :  { %1723 = shalt.err (!%p1720_p0)
}
  0x23   :  { %55 = dma.hbm_to_vmem [thread:$0]  %s2124_s3, 2048, %s50_s14, [#allocation6], %s1796_s29, %s1796_s29, %s1797_s30  }
  0x24   :  { %s1732_s0 = scalar_lea.vmem %s64_s16, 2048  ;;  %p1737_p2 = scmp.lt.s32.totalorder %s64_s16, %s64_s16 }
  0x25   :  { %p1733_p1 = scmp.ne.s32.totalorder %s64_s16, %s1732_s0  ;;  %p1738_p3 = scmp.lt.s32.totalorder %s1732_s0, %s1732_s0 }
  0x27   :  { %p1739_p4 = por %p1738_p3, %p1737_p2 }
  0x29   :  { %p1740_p5 = pnand %p1739_p4, %p1733_p1 }
  0x2b   :  { %1743 = shalt.err (!%p1740_p5)
}
  0x2c   :  { %69 = dma.hbm_to_vmem [thread:$0]  %s2126_s5, 2048, %s64_s16, [#allocation9], %s1796_s29, %s1796_s29, %s1797_s30  }
  0x2d   :  { %1784 = dma.done.wait [#allocation3], 4096  }
  0x2e   :  { %1785 = vsyncadd [#allocation3], 4294963200 }
  0x2f   :  { %1786 = dma.done.wait [#allocation6], 4096  }
  0x30   :  { %1787 = vsyncadd [#allocation6], 4294963200 }
  0x31   :  { %1788 = dma.done.wait [#allocation9], 2048  }
  0x32   :  { %1789 = vsyncadd [#allocation9], 4294965248  ;;  %v129_v0 = vld [vmem:[#allocation5 + $0x78] sm:$0xff]  ;;  %v128_v1 = vld [vmem:[#allocation5 + $0x70] sm:$0xff] }
  0x33   :  { %1320 = vmatprep.subr.mxu0 %v129_v0  ;;  %1560 = vmatprep.subr.mxu1 %v129_v0  ;;  %v127_v2 = vld [vmem:[#allocation5 + $0x68] sm:$0xff]  ;;  %v126_v3 = vld [vmem:[#allocation5 + $0x60] sm:$0xff]  ;;  %v125_v5 = vld [vmem:[#allocation5 + $0x58] sm:$0xff] }
  0x34   :  { %1321 = vmatpush3.msra.mxu0 %v129_v0  ;;  %1576 = vmatpush3.msra.mxu1 %v129_v0  ;;  %v82_v4 = vld [vmem:[#allocation2] sm:$0xff]  ;;  %v124_v6 = vld [vmem:[#allocation5 + $0x50] sm:$0xff]  ;;  %v123_v7 = vld [vmem:[#allocation5 + $0x48] sm:$0xff] }
  0x35   :  { %1322 = vmatprep.subr.mxu0 %v128_v1  ;;  %1561 = vmatprep.subr.mxu1 %v128_v1  ;;  %v122_v8 = vld [vmem:[#allocation5 + $0x40] sm:$0xff]  ;;  %v121_v9 = vld [vmem:[#allocation5 + $0x38] sm:$0xff]  ;;  %v120_v10 = vld [vmem:[#allocation5 + $0x30] sm:$0xff] }
  0x36   :  { %1323 = vmatpush3.msra.mxu0 %v128_v1  ;;  %1577 = vmatpush3.msra.mxu1 %v128_v1  ;;  %v119_v11 = vld [vmem:[#allocation5 + $0x28] sm:$0xff]  ;;  %v118_v12 = vld [vmem:[#allocation5 + $0x20] sm:$0xff]  ;;  %v117_v13 = vld [vmem:[#allocation5 + $0x18] sm:$0xff] }
  0x37   :  { %1324 = vmatprep.subr.mxu0 %v127_v2  ;;  %1562 = vmatprep.subr.mxu1 %v127_v2  ;;  %v116_v14 = vld [vmem:[#allocation5 + $0x10] sm:$0xff]  ;;  %v115_v15 = vld [vmem:[#allocation5 + $0x8] sm:$0xff]  ;;  %v114_v16 = vld [vmem:[#allocation5] sm:$0xff] }
  0x38   :  { %1325 = vmatpush3.msra.mxu0 %v127_v2  ;;  %1352 = vmatprep.mubr.f32.mxu0 %v82_v4  ;;  %v83_v17 = vld [vmem:[#allocation2 + $0x8] sm:$0xff]  ;;  %v84_v18 = vld [vmem:[#allocation2 + $0x10] sm:$0xff]  ;;  %v98_v19 = vld [vmem:[#allocation2 + $0x80] sm:$0xff] }
  0x39   :  { %1326 = vmatprep.subr.mxu0 %v126_v3  ;;  %1578 = vmatpush3.msra.mxu1 %v127_v2  ;;  %v99_v20 = vld [vmem:[#allocation2 + $0x88] sm:$0xff]  ;;  %v409_v21 = vld [vmem:[#allocation7 + $0x78] sm:$0xff]  ;;  %v100_v22 = vld [vmem:[#allocation2 + $0x90] sm:$0xff] }
  0x3a   :  { %1327 = vmatpush3.msra.mxu0 %v126_v3  ;;  %1563 = vmatprep.subr.mxu1 %v126_v3  ;;  %v85_v23 = vld [vmem:[#allocation2 + $0x18] sm:$0xff]  ;;  %v408_v24 = vld [vmem:[#allocation7 + $0x70] sm:$0xff]  ;;  %v86_v25 = vld [vmem:[#allocation2 + $0x20] sm:$0xff] }
  0x3b   :  { %1328 = vmatprep.subr.mxu0 %v125_v5  ;;  %1579 = vmatpush3.msra.mxu1 %v126_v3  ;;  %v101_v26 = vld [vmem:[#allocation2 + $0x98] sm:$0xff]  ;;  %v407_v27 = vld [vmem:[#allocation7 + $0x68] sm:$0xff]  ;;  %v102_v28 = vld [vmem:[#allocation2 + $0xa0] sm:$0xff] }
  0x3c   :  { %1329 = vmatpush3.msra.mxu0 %v125_v5  ;;  %1564 = vmatprep.subr.mxu1 %v125_v5  ;;  %v87_v29 = vld [vmem:[#allocation2 + $0x28] sm:$0xff]  ;;  %v406_v30 = vld [vmem:[#allocation7 + $0x60] sm:$0xff]  ;;  %v88_v31 = vld [vmem:[#allocation2 + $0x30] sm:$0xff] }
  0x3d   :  { %1330 = vmatprep.subr.mxu0 %v124_v6  ;;  %1580 = vmatpush3.msra.mxu1 %v125_v5  ;;  %v103_v32 = vld [vmem:[#allocation2 + $0xa8] sm:$0xff]  ;;  %v405_v33 = vld [vmem:[#allocation7 + $0x58] sm:$0xff]  ;;  %v104_v34 = vld [vmem:[#allocation2 + $0xb0] sm:$0xff] }
  0x3e   :  { %1331 = vmatpush3.msra.mxu0 %v124_v6  ;;  %1565 = vmatprep.subr.mxu1 %v124_v6  ;;  %v89_v35 = vld [vmem:[#allocation2 + $0x38] sm:$0xff]  ;;  %v404_v36 = vld [vmem:[#allocation7 + $0x50] sm:$0xff]  ;;  %v90_v37 = vld [vmem:[#allocation2 + $0x40] sm:$0xff] }
  0x3f   :  { %1332 = vmatprep.subr.mxu0 %v123_v7  ;;  %1581 = vmatpush3.msra.mxu1 %v124_v6  ;;  %v105_v38 = vld [vmem:[#allocation2 + $0xb8] sm:$0xff]  ;;  %v403_v39 = vld [vmem:[#allocation7 + $0x48] sm:$0xff]  ;;  %v106_v40 = vld [vmem:[#allocation2 + $0xc0] sm:$0xff] }
  0x40   :  { %1333 = vmatpush3.msra.mxu0 %v123_v7  ;;  %1566 = vmatprep.subr.mxu1 %v123_v7  ;;  %v91_v41 = vld [vmem:[#allocation2 + $0x48] sm:$0xff]  ;;  %v402_v42 = vld [vmem:[#allocation7 + $0x40] sm:$0xff]  ;;  %v92_v43 = vld [vmem:[#allocation2 + $0x50] sm:$0xff] }
  0x41   :  { %1334 = vmatprep.subr.mxu0 %v122_v8  ;;  %1582 = vmatpush3.msra.mxu1 %v123_v7  ;;  %v107_v44 = vld [vmem:[#allocation2 + $0xc8] sm:$0xff]  ;;  %v401_v45 = vld [vmem:[#allocation7 + $0x38] sm:$0xff]  ;;  %v108_v46 = vld [vmem:[#allocation2 + $0xd0] sm:$0xff] }
  0x42   :  { %1335 = vmatpush3.msra.mxu0 %v122_v8  ;;  %1567 = vmatprep.subr.mxu1 %v122_v8  ;;  %v93_v47 = vld [vmem:[#allocation2 + $0x58] sm:$0xff]  ;;  %v400_v48 = vld [vmem:[#allocation7 + $0x30] sm:$0xff]  ;;  %v94_v49 = vld [vmem:[#allocation2 + $0x60] sm:$0xff] }
  0x43   :  { %1336 = vmatprep.subr.mxu0 %v121_v9  ;;  %1583 = vmatpush3.msra.mxu1 %v122_v8  ;;  %v109_v50 = vld [vmem:[#allocation2 + $0xd8] sm:$0xff]  ;;  %v399_v51 = vld [vmem:[#allocation7 + $0x28] sm:$0xff]  ;;  %v110_v52 = vld [vmem:[#allocation2 + $0xe0] sm:$0xff] }
  0x44   :  { %1337 = vmatpush3.msra.mxu0 %v121_v9  ;;  %1568 = vmatprep.subr.mxu1 %v121_v9  ;;  %v95_v53 = vld [vmem:[#allocation2 + $0x68] sm:$0xff]  ;;  %v398_v54 = vld [vmem:[#allocation7 + $0x20] sm:$0xff]  ;;  %v96_v55 = vld [vmem:[#allocation2 + $0x70] sm:$0xff] }
  0x45   :  { %1338 = vmatprep.subr.mxu0 %v120_v10  ;;  %1584 = vmatpush3.msra.mxu1 %v121_v9  ;;  %v111_v56 = vld [vmem:[#allocation2 + $0xe8] sm:$0xff]  ;;  %v397_v57 = vld [vmem:[#allocation7 + $0x18] sm:$0xff]  ;;  %v112_v58 = vld [vmem:[#allocation2 + $0xf0] sm:$0xff] }
  0x46   :  { %1339 = vmatpush3.msra.mxu0 %v120_v10  ;;  %1569 = vmatprep.subr.mxu1 %v120_v10  ;;  %v97_v59 = vld [vmem:[#allocation2 + $0x78] sm:$0xff]  ;;  %v396_v61 = vld [vmem:[#allocation7 + $0x10] sm:$0xff]  ;;  %v395_v62 = vld [vmem:[#allocation7 + $0x8] sm:$0xff] }
  0x47   :  { %1340 = vmatprep.subr.mxu0 %v119_v11  ;;  %1585 = vmatpush3.msra.mxu1 %v120_v10  ;;  %v113_v60 = vld [vmem:[#allocation2 + $0xf8] sm:$0xff]  ;;  %v394_v63 = vld [vmem:[#allocation7] sm:$0xff] }
  0x48   :  { %1341 = vmatpush3.msra.mxu0 %v119_v11  ;;  %1570 = vmatprep.subr.mxu1 %v119_v11  ;;  %v1869_v0 = vld [vmem:[%s2123_s2] ss:$0 sm:$0xff] }
  0x49   :  { %1342 = vmatprep.subr.mxu0 %v118_v12  ;;  %1586 = vmatpush3.msra.mxu1 %v119_v11 }
  0x4a   :  { %1343 = vmatpush3.msra.mxu0 %v118_v12  ;;  %1571 = vmatprep.subr.mxu1 %v118_v12 }
  0x4b   :  { %1344 = vmatprep.subr.mxu0 %v117_v13  ;;  %1587 = vmatpush3.msra.mxu1 %v118_v12 }
  0x4c   :  { %1345 = vmatpush3.msra.mxu0 %v117_v13  ;;  %1572 = vmatprep.subr.mxu1 %v117_v13 }
  0x4d   :  { %1346 = vmatprep.subr.mxu0 %v116_v14  ;;  %1588 = vmatpush3.msra.mxu1 %v117_v13 }
  0x4e   :  { %1347 = vmatpush3.msra.mxu0 %v116_v14  ;;  %1573 = vmatprep.subr.mxu1 %v116_v14 }
  0x4f   :  { %1348 = vmatprep.subr.mxu0 %v115_v15  ;;  %1589 = vmatpush3.msra.mxu1 %v116_v14 }
  0x50   :  { %1349 = vmatpush3.msra.mxu0 %v115_v15  ;;  %1574 = vmatprep.subr.mxu1 %v115_v15 }
  0x51   :  { %1350 = vmatprep.subr.mxu0 %v114_v16  ;;  %1590 = vmatpush3.msra.mxu1 %v115_v15 }
  0x52   :  { %1351 = vmatpush3.msra.mxu0 %v114_v16  ;;  %1575 = vmatprep.subr.mxu1 %v114_v16 }
  0x53   :  { %1353 = vmatmul.mubr.f32.vlgmr.msra.gmra.mxu0 %v83_v17  ;;  %1591 = vmatpush3.msra.mxu1 %v114_v16 }
  0x54   :  { %1355 = vmatprep.mubr.f32.mxu0 %v84_v18  ;;  %1376 = vmatprep.mubr.f32.mxu1 %v98_v19 }
  0x55   :  { %1377 = vmatmul.mubr.f32.vlgmr.msra.gmra.mxu1 %v99_v20  ;;  %1400 = vmatprep.subr.mxu1 %v409_v21 }
  0x56   :  { %1379 = vmatprep.mubr.f32.mxu1 %v100_v22  ;;  %1401 = vmatpush3.msra.mxu1 %v409_v21 }
  0x57   :  { %1356 = vmatmul.mubr.f32.gmra.mxu0 %v85_v23  ;;  %1402 = vmatprep.subr.mxu1 %v408_v24 }
  0x58   :  { %1358 = vmatprep.mubr.f32.mxu0 %v86_v25  ;;  %1403 = vmatpush3.msra.mxu1 %v408_v24 }
  0x59   :  { %1380 = vmatmul.mubr.f32.gmra.mxu1 %v101_v26  ;;  %1404 = vmatprep.subr.mxu1 %v407_v27 }
  0x5a   :  { %1382 = vmatprep.mubr.f32.mxu1 %v102_v28  ;;  %1405 = vmatpush3.msra.mxu1 %v407_v27 }
  0x5b   :  { %1359 = vmatmul.mubr.f32.gmra.mxu0 %v87_v29  ;;  %1406 = vmatprep.subr.mxu1 %v406_v30 }
  0x5c   :  { %1361 = vmatprep.mubr.f32.mxu0 %v88_v31  ;;  %1407 = vmatpush3.msra.mxu1 %v406_v30 }
  0x5d   :  { %1383 = vmatmul.mubr.f32.gmra.mxu1 %v103_v32  ;;  %1408 = vmatprep.subr.mxu1 %v405_v33 }
  0x5e   :  { %1385 = vmatprep.mubr.f32.mxu1 %v104_v34  ;;  %1409 = vmatpush3.msra.mxu1 %v405_v33 }
  0x5f   :  { %1362 = vmatmul.mubr.f32.gmra.mxu0 %v89_v35  ;;  %1410 = vmatprep.subr.mxu1 %v404_v36 }
  0x60   :  { %1364 = vmatprep.mubr.f32.mxu0 %v90_v37  ;;  %1411 = vmatpush3.msra.mxu1 %v404_v36 }
  0x61   :  { %1386 = vmatmul.mubr.f32.gmra.mxu1 %v105_v38  ;;  %1412 = vmatprep.subr.mxu1 %v403_v39 }
  0x62   :  { %1388 = vmatprep.mubr.f32.mxu1 %v106_v40  ;;  %1413 = vmatpush3.msra.mxu1 %v403_v39 }
  0x63   :  { %1365 = vmatmul.mubr.f32.gmra.mxu0 %v91_v41  ;;  %1414 = vmatprep.subr.mxu1 %v402_v42 }
  0x64   :  { %1367 = vmatprep.mubr.f32.mxu0 %v92_v43  ;;  %1415 = vmatpush3.msra.mxu1 %v402_v42 }
  0x65   :  { %1389 = vmatmul.mubr.f32.gmra.mxu1 %v107_v44  ;;  %1416 = vmatprep.subr.mxu1 %v401_v45 }
  0x66   :  { %1391 = vmatprep.mubr.f32.mxu1 %v108_v46  ;;  %1417 = vmatpush3.msra.mxu1 %v401_v45 }
  0x67   :  { %1368 = vmatmul.mubr.f32.gmra.mxu0 %v93_v47  ;;  %1418 = vmatprep.subr.mxu1 %v400_v48 }
  0x68   :  { %1370 = vmatprep.mubr.f32.mxu0 %v94_v49  ;;  %1419 = vmatpush3.msra.mxu1 %v400_v48 }
  0x69   :  { %1392 = vmatmul.mubr.f32.gmra.mxu1 %v109_v50  ;;  %1420 = vmatprep.subr.mxu1 %v399_v51 }
  0x6a   :  { %1394 = vmatprep.mubr.f32.mxu1 %v110_v52  ;;  %1421 = vmatpush3.msra.mxu1 %v399_v51 }
  0x6b   :  { %1371 = vmatmul.mubr.f32.gmra.mxu0 %v95_v53  ;;  %1422 = vmatprep.subr.mxu1 %v398_v54 }
  0x6c   :  { %1373 = vmatprep.mubr.f32.mxu0 %v96_v55  ;;  %1423 = vmatpush3.msra.mxu1 %v398_v54 }
  0x6d   :  { %1395 = vmatmul.mubr.f32.gmra.mxu1 %v111_v56  ;;  %1424 = vmatprep.subr.mxu1 %v397_v57 }
  0x6e   :  { %1397 = vmatprep.mubr.f32.mxu1 %v112_v58  ;;  %1425 = vmatpush3.msra.mxu1 %v397_v57 }
  0x6f   :  { %1374 = vmatmul.mubr.f32.gmra.mxu0 %v97_v59  ;;  %1426 = vmatprep.subr.mxu1 %v396_v61 }
  0x70   :  { %1427 = vmatpush3.msra.mxu1 %v396_v61 }
  0x71   :  { %1398 = vmatmul.mubr.f32.gmra.mxu1 %v113_v60  ;;  %1428 = vmatprep.subr.mxu1 %v395_v62 }
  0x72   :  { %1429 = vmatpush3.msra.mxu1 %v395_v62 }
  0x73   :  { %1430 = vmatprep.subr.mxu1 %v394_v63 }
  0x74   :  { %1431 = vmatpush3.msra.mxu1 %v394_v63 }
 0x113   :  { %v1354_v1 = vpop.f32.mrf.mxu0 }
 0x114   :  { %v209_v2 = vadd.f32 %v1354_v1, %v1869_v0 }
 0x115   :  { %v203_v3 = vpop.f32.mrf.mxu0  ;;  %v1872_v4 = vpop.f32.mrf.mxu1 }
 0x116   :  { %v204_v5 = vadd.f32 %v1869_v0, %v203_v3  ;;  %v363_v9 = vmax.f32 %v209_v2, 0.0  ;;  %v289_v59 = vadd.f32 %v1872_v4, %v1869_v0 }
 0x117   :  { %v1357_v6 = vpop.f32.mrf.mxu0  ;;  %v283_v7 = vpop.f32.mrf.mxu1 }
 0x118   :  { %v362_v8 = vmax.f32 %v204_v5, 0.0  ;;  %v219_v10 = vadd.f32 %v1357_v6, %v1869_v0  ;;  %v284_v54 = vadd.f32 %v1869_v0, %v283_v7  ;;  %v379_v1 = vmax.f32 %v289_v59, 0.0 }
 0x119   :  { %v213_v11 = vpop.f32.mrf.mxu0  ;;  %v1876_v12 = vpop.f32.mrf.mxu1 }
 0x11a   :  { %v214_v13 = vadd.f32 %v1869_v0, %v213_v11  ;;  %1432 = vmatprep.mubr.f32.mxu1 %v362_v8  ;;  %v365_v18 = vmax.f32 %v219_v10, 0.0  ;;  %v378_v61 = vmax.f32 %v284_v54, 0.0  ;;  %v299_v2 = vadd.f32 %v1876_v12, %v1869_v0 }
 0x11b   :  { %v1360_v14 = vpop.f32.mrf.mxu0  ;;  %1433 = vmatmul.mubr.f32.vlgmr.msra.gmra.mxu1 %v363_v9  ;;  %v293_v15 = vpop.f32.mrf.mxu1 }
 0x11c   :  { %v364_v16 = vmax.f32 %v214_v13, 0.0  ;;  %v229_v17 = vadd.f32 %v1360_v14, %v1869_v0  ;;  %v294_v62 = vadd.f32 %v1869_v0, %v293_v15  ;;  %v381_v7 = vmax.f32 %v299_v2, 0.0  ;;  %v875_v2 = vld [vmem:[#allocation8 + $0x48] sm:$0xff] }
 0x11d   :  { %v223_v19 = vpop.f32.mrf.mxu0  ;;  %v1880_v20 = vpop.f32.mrf.mxu1 }
 0x11e   :  { %v224_v21 = vadd.f32 %v1869_v0, %v223_v19  ;;  %1435 = vmatprep.mubr.f32.mxu1 %v364_v16  ;;  %v367_v22 = vmax.f32 %v229_v17, 0.0  ;;  %v380_v3 = vmax.f32 %v294_v62, 0.0  ;;  %v309_v4 = vadd.f32 %v1880_v20, %v1869_v0 }
 0x11f   :  { %v1363_v23 = vpop.f32.mrf.mxu0  ;;  %1436 = vmatmul.mubr.f32.gmra.mxu1 %v365_v18  ;;  %v303_v27 = vpop.f32.mrf.mxu1 }
 0x120   :  { %v366_v24 = vmax.f32 %v224_v21, 0.0  ;;  %v239_v25 = vadd.f32 %v1363_v23, %v1869_v0  ;;  %v304_v5 = vadd.f32 %v1869_v0, %v303_v27  ;;  %v383_v11 = vmax.f32 %v309_v4, 0.0 }
 0x121   :  { %v233_v26 = vpop.f32.mrf.mxu0  ;;  %v1387_v34 = vpop.f32.mrf.mxu1 }
 0x122   :  { %v234_v28 = vadd.f32 %v1869_v0, %v233_v26  ;;  %1438 = vmatprep.mubr.f32.mxu1 %v366_v24  ;;  %v369_v29 = vmax.f32 %v239_v25, 0.0  ;;  %v382_v8 = vmax.f32 %v304_v5, 0.0  ;;  %v319_v13 = vadd.f32 %v1387_v34, %v1869_v0  ;;  %v881_v34 = vld [vmem:[#allocation8 + $0x78] sm:$0xff]  ;;  %v874_v5 = vld [vmem:[#allocation8 + $0x40] sm:$0xff] }
 0x123   :  { %v1366_v30 = vpop.f32.mrf.mxu0  ;;  %1439 = vmatmul.mubr.f32.gmra.mxu1 %v367_v22  ;;  %v313_v41 = vpop.f32.mrf.mxu1  ;;  %1480 = vmatprep.subr.mxu0 %v881_v34 }
 0x124   :  { %v368_v31 = vmax.f32 %v234_v28, 0.0  ;;  %v249_v32 = vadd.f32 %v1366_v30, %v1869_v0  ;;  %v314_v9 = vadd.f32 %v1869_v0, %v313_v41  ;;  %v385_v16 = vmax.f32 %v319_v13, 0.0  ;;  %1481 = vmatpush3.msra.mxu0 %v881_v34  ;;  %v868_v34 = vld [vmem:[#allocation8 + $0x10] sm:$0xff] }
 0x125   :  { %v243_v33 = vpop.f32.mrf.mxu0  ;;  %v1390_v48 = vpop.f32.mrf.mxu1 }
 0x126   :  { %v244_v35 = vadd.f32 %v1869_v0, %v243_v33  ;;  %1441 = vmatprep.mubr.f32.mxu1 %v368_v31  ;;  %v371_v36 = vmax.f32 %v249_v32, 0.0  ;;  %v384_v12 = vmax.f32 %v314_v9, 0.0  ;;  %v329_v17 = vadd.f32 %v1390_v48, %v1869_v0 }
 0x127   :  { %v1369_v37 = vpop.f32.mrf.mxu0  ;;  %1442 = vmatmul.mubr.f32.gmra.mxu1 %v369_v29  ;;  %v323_v56 = vpop.f32.mrf.mxu1 }
 0x128   :  { %v370_v38 = vmax.f32 %v244_v35, 0.0  ;;  %v259_v39 = vadd.f32 %v1369_v37, %v1869_v0  ;;  %v324_v14 = vadd.f32 %v1869_v0, %v323_v56  ;;  %v387_v21 = vmax.f32 %v329_v17, 0.0  ;;  %v880_v35 = vld [vmem:[#allocation8 + $0x70] sm:$0xff]  ;;  %v878_v37 = vld [vmem:[#allocation8 + $0x60] sm:$0xff] }
 0x129   :  { %v253_v40 = vpop.f32.mrf.mxu0  ;;  %v1393_v63 = vpop.f32.mrf.mxu1  ;;  %1482 = vmatprep.subr.mxu0 %v880_v35 }
 0x12a   :  { %v254_v42 = vadd.f32 %v1869_v0, %v253_v40  ;;  %1444 = vmatprep.mubr.f32.mxu1 %v370_v38  ;;  %v373_v43 = vmax.f32 %v259_v39, 0.0  ;;  %v386_v18 = vmax.f32 %v324_v14, 0.0  ;;  %v339_v22 = vadd.f32 %v1393_v63, %v1869_v0  ;;  %1483 = vmatpush3.msra.mxu0 %v880_v35  ;;  %v877_v38 = vld [vmem:[#allocation8 + $0x58] sm:$0xff]  ;;  %v1915_v40 = vld [vmem:[%s2125_s4] ss:$0 sm:$0xff]  ;;  %s1800_s4 = smov [#allocation10]  }
 0x12b   :  { %v1372_v44 = vpop.f32.mrf.mxu0  ;;  %1445 = vmatmul.mubr.f32.gmra.mxu1 %v371_v36  ;;  %v333_v6 = vpop.f32.mrf.mxu1  ;;  %v879_v36 = vld [vmem:[#allocation8 + $0x68] sm:$0xff]  ;;  %s1144_s22 = sshll.u32 %s1800_s4, 4  ;;  %s1145_s22 = int_to_ptr.vmem [resolvable:$true] %s1144_s22 }
 0x12c   :  { %v372_v45 = vmax.f32 %v254_v42, 0.0  ;;  %v269_v46 = vadd.f32 %v1372_v44, %v1869_v0  ;;  %v334_v19 = vadd.f32 %v1869_v0, %v333_v6  ;;  %v389_v26 = vmax.f32 %v339_v22, 0.0  ;;  %1484 = vmatprep.subr.mxu0 %v879_v36  ;;  %s1744_s23 = scalar_lea.vmem %s1145_s22, 4096  ;;  %p1749_p7 = scmp.lt.s32.totalorder %s1145_s22, %s1145_s22 }
 0x12d   :  { %v263_v47 = vpop.f32.mrf.mxu0  ;;  %v1396_v10 = vpop.f32.mrf.mxu1  ;;  %1485 = vmatpush3.msra.mxu0 %v879_v36  ;;  %p1745_p6 = scmp.ne.s32.totalorder %s1145_s22, %s1744_s23  ;;  %p1750_p8 = scmp.lt.s32.totalorder %s1744_s23, %s1744_s23 }
 0x12e   :  { %v264_v49 = vadd.f32 %v1869_v0, %v263_v47  ;;  %1447 = vmatprep.mubr.f32.mxu1 %v372_v45  ;;  %v375_v50 = vmax.f32 %v269_v46, 0.0  ;;  %v388_v23 = vmax.f32 %v334_v19, 0.0  ;;  %v349_v27 = vadd.f32 %v1396_v10, %v1869_v0  ;;  %1486 = vmatprep.subr.mxu0 %v878_v37  ;;  %v871_v19 = vld [vmem:[#allocation8 + $0x28] sm:$0xff] }
 0x12f   :  { %v1375_v51 = vpop.f32.mrf.mxu0  ;;  %1448 = vmatmul.mubr.f32.gmra.mxu1 %v373_v43  ;;  %v343_v15 = vpop.f32.mrf.mxu1  ;;  %1487 = vmatpush3.msra.mxu0 %v878_v37  ;;  %p1751_p9 = por %p1750_p8, %p1749_p7 }
 0x130   :  { %v374_v52 = vmax.f32 %v264_v49, 0.0  ;;  %v279_v53 = vadd.f32 %v1375_v51, %v1869_v0  ;;  %v344_v24 = vadd.f32 %v1869_v0, %v343_v15  ;;  %v391_v30 = vmax.f32 %v349_v27, 0.0  ;;  %1488 = vmatprep.subr.mxu0 %v877_v38 }
 0x131   :  { %v273_v55 = vpop.f32.mrf.mxu0  ;;  %v1399_v20 = vpop.f32.mrf.mxu1  ;;  %1489 = vmatpush3.msra.mxu0 %v877_v38  ;;  %p1752_p10 = pnand %p1751_p9, %p1745_p6 }
 0x132   :  { %v274_v57 = vadd.f32 %v1869_v0, %v273_v55  ;;  %1450 = vmatprep.mubr.f32.mxu1 %v374_v52  ;;  %v377_v58 = vmax.f32 %v279_v53, 0.0  ;;  %v390_v28 = vmax.f32 %v344_v24, 0.0  ;;  %v359_v31 = vadd.f32 %v1399_v20, %v1869_v0 }
 0x133   :  { %1451 = vmatmul.mubr.f32.gmra.mxu1 %v375_v50  ;;  %v353_v25 = vpop.f32.mrf.mxu1 }
 0x134   :  { %v376_v60 = vmax.f32 %v274_v57, 0.0  ;;  %v354_v29 = vadd.f32 %v1869_v0, %v353_v25  ;;  %v393_v33 = vmax.f32 %v359_v31, 0.0  ;;  %v876_v0 = vld [vmem:[#allocation8 + $0x50] sm:$0xff]  ;;  %v870_v25 = vld [vmem:[#allocation8 + $0x20] sm:$0xff]  ;;  %v869_v31 = vld [vmem:[#allocation8 + $0x18] sm:$0xff] }
 0x135   :  { %1490 = vmatprep.subr.mxu0 %v876_v0 }
 0x136   :  { %1453 = vmatprep.mubr.f32.mxu1 %v376_v60  ;;  %v392_v32 = vmax.f32 %v354_v29, 0.0  ;;  %1491 = vmatpush3.msra.mxu0 %v876_v0 }
 0x137   :  { %1454 = vmatmul.mubr.f32.gmra.mxu1 %v377_v58  ;;  %1492 = vmatprep.subr.mxu0 %v875_v2 }
 0x138   :  { %1456 = vmatprep.mubr.f32.mxu1 %v378_v61  ;;  %1493 = vmatpush3.msra.mxu0 %v875_v2 }
 0x139   :  { %1494 = vmatprep.subr.mxu0 %v874_v5 }
 0x13a   :  { %1495 = vmatpush3.msra.mxu0 %v874_v5 }
 0x13b   :  { %1457 = vmatmul.mubr.f32.gmra.mxu1 %v379_v1 }
 0x13c   :  { %1459 = vmatprep.mubr.f32.mxu1 %v380_v3 }
 0x13f   :  { %1460 = vmatmul.mubr.f32.gmra.mxu1 %v381_v7 }
 0x140   :  { %1462 = vmatprep.mubr.f32.mxu1 %v382_v8 }
 0x143   :  { %1463 = vmatmul.mubr.f32.gmra.mxu1 %v383_v11  ;;  %v873_v11 = vld [vmem:[#allocation8 + $0x38] sm:$0xff] }
 0x144   :  { %1465 = vmatprep.mubr.f32.mxu1 %v384_v12  ;;  %1496 = vmatprep.subr.mxu0 %v873_v11 }
 0x145   :  { %1497 = vmatpush3.msra.mxu0 %v873_v11 }
 0x147   :  { %1466 = vmatmul.mubr.f32.gmra.mxu1 %v385_v16  ;;  %v872_v16 = vld [vmem:[#allocation8 + $0x30] sm:$0xff] }
 0x148   :  { %1468 = vmatprep.mubr.f32.mxu1 %v386_v18  ;;  %1498 = vmatprep.subr.mxu0 %v872_v16 }
 0x149   :  { %1499 = vmatpush3.msra.mxu0 %v872_v16 }
 0x14a   :  { %1500 = vmatprep.subr.mxu0 %v871_v19 }
 0x14b   :  { %1469 = vmatmul.mubr.f32.gmra.mxu1 %v387_v21  ;;  %1501 = vmatpush3.msra.mxu0 %v871_v19 }
 0x14c   :  { %1471 = vmatprep.mubr.f32.mxu1 %v388_v23  ;;  %1502 = vmatprep.subr.mxu0 %v870_v25 }
 0x14d   :  { %1503 = vmatpush3.msra.mxu0 %v870_v25 }
 0x14e   :  { %1504 = vmatprep.subr.mxu0 %v869_v31 }
 0x14f   :  { %1472 = vmatmul.mubr.f32.gmra.mxu1 %v389_v26  ;;  %1505 = vmatpush3.msra.mxu0 %v869_v31 }
 0x150   :  { %1474 = vmatprep.mubr.f32.mxu1 %v390_v28  ;;  %1506 = vmatprep.subr.mxu0 %v868_v34 }
 0x151   :  { %1507 = vmatpush3.msra.mxu0 %v868_v34 }
 0x153   :  { %1475 = vmatmul.mubr.f32.gmra.mxu1 %v391_v30 }
 0x154   :  { %1477 = vmatprep.mubr.f32.mxu1 %v392_v32 }
 0x157   :  { %1478 = vmatmul.mubr.f32.gmra.mxu1 %v393_v33 }
 0x1db   :  { %v1434_v39 = vpop.f32.mrf.mxu1 }
 0x1dc   :  { %v1921_v44 = vadd.f32 %v1434_v39, %v1915_v40  ;;  %v867_v39 = vld [vmem:[#allocation8 + $0x8] sm:$0xff] }
 0x1dd   :  { %v483_v41 = vpop.f32.mrf.mxu1  ;;  %1508 = vmatprep.subr.mxu0 %v867_v39 }
 0x1de   :  { %v1918_v42 = vadd.f32 %v1915_v40, %v483_v41  ;;  %v643_v51 = vmul.f32 %v1921_v44, %v1921_v44  ;;  %1509 = vmatpush3.msra.mxu0 %v867_v39 }
 0x1df   :  { %v1437_v43 = vpop.f32.mrf.mxu1 }
 0x1e0   :  { %v642_v45 = vmul.f32 %v1918_v42, %v1918_v42  ;;  %v1929_v49 = vadd.f32 %v1437_v43, %v1915_v40 }
 0x1e1   :  { %v493_v46 = vpop.f32.mrf.mxu1 }
 0x1e2   :  { %v1926_v47 = vadd.f32 %v1915_v40, %v493_v46  ;;  %674 = vadd.xlane.f32.xlu0 %v642_v45  ;;  %v645_v56 = vmul.f32 %v1929_v49, %v1929_v49 }
 0x1e3   :  { %v1440_v48 = vpop.f32.mrf.mxu1 }
 0x1e4   :  { %v644_v50 = vmul.f32 %v1926_v47, %v1926_v47  ;;  %v1939_v55 = vadd.f32 %v1440_v48, %v1915_v40 }
 0x1e5   :  { %v503_v52 = vpop.f32.mrf.mxu1 }
 0x1e6   :  { %v1936_v53 = vadd.f32 %v1915_v40, %v503_v52  ;;  %678 = vadd.xlane.f32.xlu1 %v644_v50  ;;  %676 = vadd.xlane.f32.xlu0 %v643_v51  ;;  %v647_v62 = vmul.f32 %v1939_v55, %v1939_v55  ;;  %v866_v50 = vld [vmem:[#allocation8] sm:$0xff] }
 0x1e7   :  { %v1443_v54 = vpop.f32.mrf.mxu1  ;;  %1510 = vmatprep.subr.mxu0 %v866_v50 }
 0x1e8   :  { %v646_v57 = vmul.f32 %v1936_v53, %v1936_v53  ;;  %v1949_v61 = vadd.f32 %v1443_v54, %v1915_v40  ;;  %1511 = vmatpush3.msra.mxu0 %v866_v50 }
 0x1e9   :  { %v513_v58 = vpop.f32.mrf.mxu1 }
 0x1ea   :  { %v1946_v59 = vadd.f32 %v1915_v40, %v513_v58  ;;  %680 = vadd.xlane.f32.xlu1 %v645_v56  ;;  %682 = vadd.xlane.f32.xlu0 %v646_v57  ;;  %v649_v4 = vmul.f32 %v1949_v61, %v1949_v61 }
 0x1eb   :  { %v1446_v60 = vpop.f32.mrf.mxu1 }
 0x1ec   :  { %v648_v63 = vmul.f32 %v1946_v59, %v1946_v59  ;;  %v1959_v7 = vadd.f32 %v1446_v60, %v1915_v40 }
 0x1ed   :  { %v523_v1 = vpop.f32.mrf.mxu1 }
 0x1ee   :  { %v1956_v3 = vadd.f32 %v1915_v40, %v523_v1  ;;  %684 = vadd.xlane.f32.xlu1 %v647_v62  ;;  %686 = vadd.xlane.f32.xlu0 %v648_v63  ;;  %v651_v14 = vmul.f32 %v1959_v7, %v1959_v7 }
 0x1ef   :  { %v1449_v6 = vpop.f32.mrf.mxu1 }
 0x1f0   :  { %v650_v8 = vmul.f32 %v1956_v3, %v1956_v3  ;;  %v1969_v12 = vadd.f32 %v1449_v6, %v1915_v40 }
 0x1f1   :  { %v533_v9 = vpop.f32.mrf.mxu1 }
 0x1f2   :  { %v1966_v10 = vadd.f32 %v1915_v40, %v533_v9  ;;  %688 = vadd.xlane.f32.xlu1 %v649_v4  ;;  %690 = vadd.xlane.f32.xlu0 %v650_v8  ;;  %v653_v22 = vmul.f32 %v1969_v12, %v1969_v12 }
 0x1f3   :  { %v1452_v13 = vpop.f32.mrf.mxu1 }
 0x1f4   :  { %v652_v15 = vmul.f32 %v1966_v10, %v1966_v10  ;;  %v1979_v21 = vadd.f32 %v1452_v13, %v1915_v40 }
 0x1f5   :  { %v543_v17 = vpop.f32.mrf.mxu1 }
 0x1f6   :  { %v1976_v18 = vadd.f32 %v1915_v40, %v543_v17  ;;  %692 = vadd.xlane.f32.xlu1 %v651_v14  ;;  %694 = vadd.xlane.f32.xlu0 %v652_v15  ;;  %v655_v29 = vmul.f32 %v1979_v21, %v1979_v21 }
 0x1f7   :  { %v1455_v20 = vpop.f32.mrf.mxu1 }
 0x1f8   :  { %v654_v23 = vmul.f32 %v1976_v18, %v1976_v18  ;;  %v1989_v28 = vadd.f32 %v1455_v20, %v1915_v40 }
 0x1f9   :  { %v553_v24 = vpop.f32.mrf.mxu1 }
 0x1fa   :  { %v1986_v26 = vadd.f32 %v1915_v40, %v553_v24  ;;  %696 = vadd.xlane.f32.xlu1 %v653_v22  ;;  %698 = vadd.xlane.f32.xlu0 %v654_v23  ;;  %v657_v37 = vmul.f32 %v1989_v28, %v1989_v28 }
 0x1fb   :  { %v1458_v27 = vpop.f32.mrf.mxu1 }
 0x1fc   :  { %v656_v30 = vmul.f32 %v1986_v26, %v1986_v26  ;;  %v1999_v36 = vadd.f32 %v1458_v27, %v1915_v40 }
 0x1fd   :  { %v563_v32 = vpop.f32.mrf.mxu1 }
 0x1fe   :  { %v1996_v33 = vadd.f32 %v1915_v40, %v563_v32  ;;  %700 = vadd.xlane.f32.xlu1 %v655_v29  ;;  %702 = vadd.xlane.f32.xlu0 %v656_v30  ;;  %v659_v46 = vmul.f32 %v1999_v36, %v1999_v36 }
 0x1ff   :  { %v1461_v35 = vpop.f32.mrf.mxu1 }
 0x200   :  { %v658_v38 = vmul.f32 %v1996_v33, %v1996_v33  ;;  %v2009_v45 = vadd.f32 %v1461_v35, %v1915_v40 }
 0x201   :  { %v573_v0 = vpop.f32.mrf.mxu1 }
 0x202   :  { %v2006_v41 = vadd.f32 %v1915_v40, %v573_v0  ;;  %704 = vadd.xlane.f32.xlu1 %v657_v37  ;;  %706 = vadd.xlane.f32.xlu0 %v658_v38  ;;  %v661_v57 = vmul.f32 %v2009_v45, %v2009_v45 }
 0x203   :  { %v1464_v43 = vpop.f32.mrf.mxu1 }
 0x204   :  { %v660_v48 = vmul.f32 %v2006_v41, %v2006_v41  ;;  %v2019_v56 = vadd.f32 %v1464_v43, %v1915_v40 }
 0x205   :  { %v583_v51 = vpop.f32.mrf.mxu1 }
 0x206   :  { %v2016_v52 = vadd.f32 %v1915_v40, %v583_v51  ;;  %708 = vadd.xlane.f32.xlu1 %v659_v46  ;;  %710 = vadd.xlane.f32.xlu0 %v660_v48  ;;  %v663_v2 = vmul.f32 %v2019_v56, %v2019_v56 }
 0x207   :  { %v1467_v54 = vpop.f32.mrf.mxu1 }
 0x208   :  { %v662_v58 = vmul.f32 %v2016_v52, %v2016_v52  ;;  %v2029_v1 = vadd.f32 %v1467_v54, %v1915_v40 }
 0x209   :  { %v593_v60 = vpop.f32.mrf.mxu1 }
 0x20a   :  { %v2026_v62 = vadd.f32 %v1915_v40, %v593_v60  ;;  %712 = vadd.xlane.f32.xlu1 %v661_v57  ;;  %714 = vadd.xlane.f32.xlu0 %v662_v58  ;;  %v665_v11 = vmul.f32 %v2029_v1, %v2029_v1 }
 0x20b   :  { %v1470_v63 = vpop.f32.mrf.mxu1 }
 0x20c   :  { %v664_v5 = vmul.f32 %v2026_v62, %v2026_v62  ;;  %v2039_v9 = vadd.f32 %v1470_v63, %v1915_v40 }
 0x20d   :  { %v603_v6 = vpop.f32.mrf.mxu1 }
 0x20e   :  { %v2036_v4 = vadd.f32 %v1915_v40, %v603_v6  ;;  %716 = vadd.xlane.f32.xlu1 %v663_v2  ;;  %718 = vadd.xlane.f32.xlu0 %v664_v5  ;;  %v667_v19 = vmul.f32 %v2039_v9, %v2039_v9 }
 0x20f   :  { %v1473_v8 = vpop.f32.mrf.mxu1 }
 0x210   :  { %v666_v13 = vmul.f32 %v2036_v4, %v2036_v4  ;;  %v2049_v17 = vadd.f32 %v1473_v8, %v1915_v40 }
 0x211   :  { %v613_v14 = vpop.f32.mrf.mxu1 }
 0x212   :  { %v2046_v15 = vadd.f32 %v1915_v40, %v613_v14  ;;  %720 = vadd.xlane.f32.xlu1 %v665_v11  ;;  %722 = vadd.xlane.f32.xlu0 %v666_v13  ;;  %v669_v27 = vmul.f32 %v2049_v17, %v2049_v17 }
 0x213   :  { %v1476_v16 = vpop.f32.mrf.mxu1 }
 0x214   :  { %v668_v20 = vmul.f32 %v2046_v15, %v2046_v15  ;;  %v2059_v25 = vadd.f32 %v1476_v16, %v1915_v40 }
 0x215   :  { %v623_v22 = vpop.f32.mrf.mxu1 }
 0x216   :  { %v2056_v23 = vadd.f32 %v1915_v40, %v623_v22  ;;  %724 = vadd.xlane.f32.xlu1 %v667_v19  ;;  %726 = vadd.xlane.f32.xlu0 %v668_v20  ;;  %v671_v34 = vmul.f32 %v2059_v25, %v2059_v25 }
 0x217   :  { %v1479_v24 = vpop.f32.mrf.mxu1 }
 0x218   :  { %v670_v29 = vmul.f32 %v2056_v23, %v2056_v23  ;;  %v2069_v32 = vadd.f32 %v1479_v24, %v1915_v40 }
 0x219   :  { %v633_v30 = vpop.f32.mrf.mxu1 }
 0x21a   :  { %v2066_v31 = vadd.f32 %v1915_v40, %v633_v30  ;;  %728 = vadd.xlane.f32.xlu1 %v669_v27  ;;  %730 = vadd.xlane.f32.xlu0 %v670_v29  ;;  %v673_v37 = vmul.f32 %v2069_v32, %v2069_v32 }
 0x21c   :  { %v672_v35 = vmul.f32 %v2066_v31, %v2066_v31 }
 0x21e   :  { %732 = vadd.xlane.f32.xlu1 %v671_v34  ;;  %734 = vadd.xlane.f32.xlu0 %v672_v35 }
 0x222   :  { %736 = vadd.xlane.f32.xlu1 %v673_v37 }
 0x26b   :  { %v675_v38 = vpop.xlane.xlu0 %674 }
 0x26c   :  { %v738_v0 = vmax.f32 %v675_v38, 1e-24 }
 0x26e   :  { %1600 = vrsqrt.f32 %v738_v0 }
 0x26f   :  { %v679_v39 = vpop.xlane.xlu1 %678  ;;  %v677_v43 = vpop.xlane.xlu0 %676 }
 0x270   :  { %v740_v46 = vmax.f32 %v679_v39, 1e-24  ;;  %v739_v40 = vmax.f32 %v677_v43, 1e-24 }
 0x272   :  { %1602 = vrsqrt.f32 %v740_v46 }
 0x273   :  { %1604 = vrsqrt.f32 %v739_v40  ;;  %v681_v48 = vpop.xlane.xlu1 %680  ;;  %v683_v50 = vpop.xlane.xlu0 %682 }
 0x274   :  { %v741_v51 = vmax.f32 %v681_v48, 1e-24  ;;  %v742_v54 = vmax.f32 %v683_v50, 1e-24 }
 0x276   :  { %1606 = vrsqrt.f32 %v741_v51 }
 0x277   :  { %1608 = vrsqrt.f32 %v742_v54  ;;  %v685_v57 = vpop.xlane.xlu1 %684  ;;  %v687_v58 = vpop.xlane.xlu0 %686 }
 0x278   :  { %v743_v60 = vmax.f32 %v685_v57, 1e-24  ;;  %v744_v63 = vmax.f32 %v687_v58, 1e-24 }
 0x27a   :  { %1610 = vrsqrt.f32 %v743_v60 }
 0x27b   :  { %v1601_v2 = vpop.eup %1600  ;;  %1612 = vrsqrt.f32 %v744_v63  ;;  %v689_v5 = vpop.xlane.xlu1 %688 }
 0x27c   :  { %v691_v6 = vpop.xlane.xlu0 %690  ;;  %v745_v8 = vmax.f32 %v689_v5, 1e-24  ;;  %v802_v13 = vmul.f32 %v1601_v2, %v1918_v42 }
 0x27d   :  { %v746_v11 = vmax.f32 %v691_v6, 1e-24 }
 0x27e   :  { %1614 = vrsqrt.f32 %v745_v8  ;;  %834 = vst [vmem:[#allocation10] sm:$0xff] %v802_v13  ;;  %1512 = vmatprep.mubr.f32.mxu0 %v802_v13 }
 0x27f   :  { %v1603_v14 = vpop.eup %1602  ;;  %1616 = vrsqrt.f32 %v746_v11  ;;  %v693_v16 = vpop.xlane.xlu1 %692 }
 0x280   :  { %v695_v19 = vpop.xlane.xlu0 %694  ;;  %v1605_v20 = vpop.eup %1604  ;;  %v747_v22 = vmax.f32 %v693_v16, 1e-24  ;;  %v804_v27 = vmul.f32 %v1603_v14, %v1926_v47 }
 0x281   :  { %v748_v24 = vmax.f32 %v695_v19, 1e-24  ;;  %v803_v29 = vmul.f32 %v1605_v20, %v1921_v44 }
 0x282   :  { %1618 = vrsqrt.f32 %v747_v22  ;;  %836 = vst [vmem:[#allocation10 + $0x10] sm:$0xff] %v804_v27 }
 0x283   :  { %v1607_v30 = vpop.eup %1606  ;;  %1620 = vrsqrt.f32 %v748_v24  ;;  %835 = vst [vmem:[#allocation10 + $0x8] sm:$0xff] %v803_v29  ;;  %1513 = vmatmul.mubr.f32.vlgmr.msra.gmra.mxu0 %v803_v29  ;;  %v697_v42 = vpop.xlane.xlu1 %696 }
 0x284   :  { %v699_v34 = vpop.xlane.xlu0 %698  ;;  %v1609_v35 = vpop.eup %1608  ;;  %v749_v37 = vmax.f32 %v697_v42, 1e-24  ;;  %1515 = vmatprep.mubr.f32.mxu0 %v804_v27  ;;  %v805_v0 = vmul.f32 %v1607_v30, %v1929_v49 }
 0x285   :  { %v750_v38 = vmax.f32 %v699_v34, 1e-24  ;;  %v806_v39 = vmul.f32 %v1609_v35, %v1936_v53 }
 0x286   :  { %1622 = vrsqrt.f32 %v749_v37  ;;  %837 = vst [vmem:[#allocation10 + $0x18] sm:$0xff] %v805_v0 }
 0x287   :  { %v1611_v47 = vpop.eup %1610  ;;  %1624 = vrsqrt.f32 %v750_v38  ;;  %1516 = vmatmul.mubr.f32.gmra.mxu0 %v805_v0  ;;  %v701_v44 = vpop.xlane.xlu1 %700  ;;  %838 = vst [vmem:[#allocation10 + $0x20] sm:$0xff] %v806_v39 }
 0x288   :  { %v703_v43 = vpop.xlane.xlu0 %702  ;;  %v1613_v46 = vpop.eup %1612  ;;  %v751_v40 = vmax.f32 %v701_v44, 1e-24  ;;  %1518 = vmatprep.mubr.f32.mxu0 %v806_v39  ;;  %v807_v50 = vmul.f32 %v1611_v47, %v1939_v55 }
 0x289   :  { %v752_v48 = vmax.f32 %v703_v43, 1e-24  ;;  %v808_v51 = vmul.f32 %v1613_v46, %v1946_v59 }
 0x28a   :  { %1626 = vrsqrt.f32 %v751_v40  ;;  %839 = vst [vmem:[#allocation10 + $0x28] sm:$0xff] %v807_v50 }
 0x28b   :  { %v1615_v49 = vpop.eup %1614  ;;  %1628 = vrsqrt.f32 %v752_v48  ;;  %1519 = vmatmul.mubr.f32.gmra.mxu0 %v807_v50  ;;  %v705_v53 = vpop.xlane.xlu1 %704  ;;  %840 = vst [vmem:[#allocation10 + $0x30] sm:$0xff] %v808_v51 }
 0x28c   :  { %v707_v54 = vpop.xlane.xlu0 %706  ;;  %v1617_v57 = vpop.eup %1616  ;;  %v753_v58 = vmax.f32 %v705_v53, 1e-24  ;;  %1521 = vmatprep.mubr.f32.mxu0 %v808_v51  ;;  %v809_v63 = vmul.f32 %v1615_v49, %v1949_v61 }
 0x28d   :  { %v754_v60 = vmax.f32 %v707_v54, 1e-24  ;;  %v810_v2 = vmul.f32 %v1617_v57, %v1956_v3 }
 0x28e   :  { %1630 = vrsqrt.f32 %v753_v58  ;;  %841 = vst [vmem:[#allocation10 + $0x38] sm:$0xff] %v809_v63 }
 0x28f   :  { %v1619_v55 = vpop.eup %1618  ;;  %1632 = vrsqrt.f32 %v754_v60  ;;  %1522 = vmatmul.mubr.f32.gmra.mxu0 %v809_v63  ;;  %v709_v59 = vpop.xlane.xlu1 %708  ;;  %842 = vst [vmem:[#allocation10 + $0x40] sm:$0xff] %v810_v2 }
 0x290   :  { %v711_v5 = vpop.xlane.xlu0 %710  ;;  %v1621_v6 = vpop.eup %1620  ;;  %v755_v8 = vmax.f32 %v709_v59, 1e-24  ;;  %1524 = vmatprep.mubr.f32.mxu0 %v810_v2  ;;  %v811_v13 = vmul.f32 %v1619_v55, %v1959_v7 }
 0x291   :  { %v756_v11 = vmax.f32 %v711_v5, 1e-24  ;;  %v812_v14 = vmul.f32 %v1621_v6, %v1966_v10 }
 0x292   :  { %1634 = vrsqrt.f32 %v755_v8  ;;  %843 = vst [vmem:[#allocation10 + $0x48] sm:$0xff] %v811_v13 }
 0x293   :  { %v1623_v61 = vpop.eup %1622  ;;  %1636 = vrsqrt.f32 %v756_v11  ;;  %1525 = vmatmul.mubr.f32.gmra.mxu0 %v811_v13  ;;  %v713_v3 = vpop.xlane.xlu1 %712  ;;  %844 = vst [vmem:[#allocation10 + $0x50] sm:$0xff] %v812_v14 }
 0x294   :  { %v715_v16 = vpop.xlane.xlu0 %714  ;;  %v1625_v19 = vpop.eup %1624  ;;  %v757_v20 = vmax.f32 %v713_v3, 1e-24  ;;  %1527 = vmatprep.mubr.f32.mxu0 %v812_v14  ;;  %v813_v24 = vmul.f32 %v1623_v61, %v1969_v12 }
 0x295   :  { %v758_v22 = vmax.f32 %v715_v16, 1e-24  ;;  %v814_v27 = vmul.f32 %v1625_v19, %v1976_v18 }
 0x296   :  { %1638 = vrsqrt.f32 %v757_v20  ;;  %845 = vst [vmem:[#allocation10 + $0x58] sm:$0xff] %v813_v24 }
 0x297   :  { %v1627_v7 = vpop.eup %1626  ;;  %1640 = vrsqrt.f32 %v758_v22  ;;  %1528 = vmatmul.mubr.f32.gmra.mxu0 %v813_v24  ;;  %v717_v10 = vpop.xlane.xlu1 %716  ;;  %846 = vst [vmem:[#allocation10 + $0x60] sm:$0xff] %v814_v27 }
 0x298   :  { %v719_v29 = vpop.xlane.xlu0 %718  ;;  %v1629_v30 = vpop.eup %1628  ;;  %v759_v42 = vmax.f32 %v717_v10, 1e-24  ;;  %1530 = vmatprep.mubr.f32.mxu0 %v814_v27  ;;  %v815_v35 = vmul.f32 %v1627_v7, %v1979_v21 }
 0x299   :  { %v760_v34 = vmax.f32 %v719_v29, 1e-24  ;;  %v816_v37 = vmul.f32 %v1629_v30, %v1986_v26 }
 0x29a   :  { %1642 = vrsqrt.f32 %v759_v42  ;;  %847 = vst [vmem:[#allocation10 + $0x68] sm:$0xff] %v815_v35 }
 0x29b   :  { %v1631_v12 = vpop.eup %1630  ;;  %1644 = vrsqrt.f32 %v760_v34  ;;  %1531 = vmatmul.mubr.f32.gmra.mxu0 %v815_v35  ;;  %v721_v18 = vpop.xlane.xlu1 %720  ;;  %848 = vst [vmem:[#allocation10 + $0x70] sm:$0xff] %v816_v37 }
 0x29c   :  { %v723_v38 = vpop.xlane.xlu0 %722  ;;  %v1633_v0 = vpop.eup %1632  ;;  %v761_v39 = vmax.f32 %v721_v18, 1e-24  ;;  %1533 = vmatprep.mubr.f32.mxu0 %v816_v37  ;;  %v817_v44 = vmul.f32 %v1631_v12, %v1989_v28 }
 0x29d   :  { %v762_v47 = vmax.f32 %v723_v38, 1e-24  ;;  %v818_v43 = vmul.f32 %v1633_v0, %v1996_v33 }
 0x29e   :  { %1646 = vrsqrt.f32 %v761_v39  ;;  %849 = vst [vmem:[#allocation10 + $0x78] sm:$0xff] %v817_v44 }
 0x29f   :  { %v1635_v21 = vpop.eup %1634  ;;  %1648 = vrsqrt.f32 %v762_v47  ;;  %1534 = vmatmul.mubr.f32.gmra.mxu0 %v817_v44  ;;  %v725_v26 = vpop.xlane.xlu1 %724  ;;  %850 = vst [vmem:[#allocation10 + $0x80] sm:$0xff] %v818_v43 }
 0x2a0   :  { %v727_v46 = vpop.xlane.xlu0 %726  ;;  %v1637_v40 = vpop.eup %1636  ;;  %v763_v48 = vmax.f32 %v725_v26, 1e-24  ;;  %1536 = vmatprep.mubr.f32.mxu0 %v818_v43  ;;  %v819_v51 = vmul.f32 %v1635_v21, %v1999_v36 }
 0x2a1   :  { %v764_v50 = vmax.f32 %v727_v46, 1e-24  ;;  %v820_v49 = vmul.f32 %v1637_v40, %v2006_v41 }
 0x2a2   :  { %1650 = vrsqrt.f32 %v763_v48  ;;  %851 = vst [vmem:[#allocation10 + $0x88] sm:$0xff] %v819_v51 }
 0x2a3   :  { %v1639_v28 = vpop.eup %1638  ;;  %1652 = vrsqrt.f32 %v764_v50  ;;  %1537 = vmatmul.mubr.f32.gmra.mxu0 %v819_v51  ;;  %v729_v33 = vpop.xlane.xlu1 %728  ;;  %852 = vst [vmem:[#allocation10 + $0x90] sm:$0xff] %v820_v49 }
 0x2a4   :  { %v731_v53 = vpop.xlane.xlu0 %730  ;;  %v1641_v54 = vpop.eup %1640  ;;  %v765_v57 = vmax.f32 %v729_v33, 1e-24  ;;  %1539 = vmatprep.mubr.f32.mxu0 %v820_v49  ;;  %v821_v60 = vmul.f32 %v1639_v28, %v2009_v45 }
 0x2a5   :  { %v766_v58 = vmax.f32 %v731_v53, 1e-24  ;;  %v822_v63 = vmul.f32 %v1641_v54, %v2016_v52 }
 0x2a6   :  { %1654 = vrsqrt.f32 %v765_v57  ;;  %853 = vst [vmem:[#allocation10 + $0x98] sm:$0xff] %v821_v60 }
 0x2a7   :  { %v1643_v36 = vpop.eup %1642  ;;  %1656 = vrsqrt.f32 %v766_v58  ;;  %1540 = vmatmul.mubr.f32.gmra.mxu0 %v821_v60  ;;  %v733_v41 = vpop.xlane.xlu1 %732  ;;  %854 = vst [vmem:[#allocation10 + $0xa0] sm:$0xff] %v822_v63 }
 0x2a8   :  { %v735_v2 = vpop.xlane.xlu0 %734  ;;  %v1645_v55 = vpop.eup %1644  ;;  %v767_v59 = vmax.f32 %v733_v41, 1e-24  ;;  %1542 = vmatprep.mubr.f32.mxu0 %v822_v63  ;;  %v823_v6 = vmul.f32 %v1643_v36, %v2019_v56 }
 0x2a9   :  { %v768_v5 = vmax.f32 %v735_v2, 1e-24  ;;  %v824_v8 = vmul.f32 %v1645_v55, %v2026_v62 }
 0x2aa   :  { %1658 = vrsqrt.f32 %v767_v59  ;;  %855 = vst [vmem:[#allocation10 + $0xa8] sm:$0xff] %v823_v6 }
 0x2ab   :  { %v1647_v45 = vpop.eup %1646  ;;  %1660 = vrsqrt.f32 %v768_v5  ;;  %1543 = vmatmul.mubr.f32.gmra.mxu0 %v823_v6  ;;  %v737_v52 = vpop.xlane.xlu1 %736  ;;  %856 = vst [vmem:[#allocation10 + $0xb0] sm:$0xff] %v824_v8 }
 0x2ac   :  { %v1649_v11 = vpop.eup %1648  ;;  %v769_v13 = vmax.f32 %v737_v52, 1e-24  ;;  %1545 = vmatprep.mubr.f32.mxu0 %v824_v8  ;;  %v825_v14 = vmul.f32 %v1647_v45, %v2029_v1 }
 0x2ad   :  { %v826_v61 = vmul.f32 %v1649_v11, %v2036_v4 }
 0x2ae   :  { %1662 = vrsqrt.f32 %v769_v13  ;;  %857 = vst [vmem:[#allocation10 + $0xb8] sm:$0xff] %v825_v14 }
 0x2af   :  { %v1651_v3 = vpop.eup %1650  ;;  %1546 = vmatmul.mubr.f32.gmra.mxu0 %v825_v14  ;;  %858 = vst [vmem:[#allocation10 + $0xc0] sm:$0xff] %v826_v61 }
 0x2b0   :  { %v1653_v56 = vpop.eup %1652  ;;  %1548 = vmatprep.mubr.f32.mxu0 %v826_v61  ;;  %v827_v62 = vmul.f32 %v1651_v3, %v2039_v9 }
 0x2b1   :  { %v828_v16 = vmul.f32 %v1653_v56, %v2046_v15 }
 0x2b2   :  { %859 = vst [vmem:[#allocation10 + $0xc8] sm:$0xff] %v827_v62 }
 0x2b3   :  { %v1655_v19 = vpop.eup %1654  ;;  %1549 = vmatmul.mubr.f32.gmra.mxu0 %v827_v62  ;;  %860 = vst [vmem:[#allocation10 + $0xd0] sm:$0xff] %v828_v16 }
 0x2b4   :  { %v1657_v20 = vpop.eup %1656  ;;  %1551 = vmatprep.mubr.f32.mxu0 %v828_v16  ;;  %v829_v1 = vmul.f32 %v1655_v19, %v2049_v17 }
 0x2b5   :  { %v830_v4 = vmul.f32 %v1657_v20, %v2056_v23 }
 0x2b6   :  { %861 = vst [vmem:[#allocation10 + $0xd8] sm:$0xff] %v829_v1 }
 0x2b7   :  { %v1659_v22 = vpop.eup %1658  ;;  %1552 = vmatmul.mubr.f32.gmra.mxu0 %v829_v1  ;;  %862 = vst [vmem:[#allocation10 + $0xe0] sm:$0xff] %v830_v4 }
 0x2b8   :  { %v1661_v24 = vpop.eup %1660  ;;  %1554 = vmatprep.mubr.f32.mxu0 %v830_v4  ;;  %v831_v9 = vmul.f32 %v1659_v22, %v2059_v25 }
 0x2b9   :  { %v832_v15 = vmul.f32 %v1661_v24, %v2066_v31 }
 0x2ba   :  { %863 = vst [vmem:[#allocation10 + $0xe8] sm:$0xff] %v831_v9 }
 0x2bb   :  { %v1663_v27 = vpop.eup %1662  ;;  %1555 = vmatmul.mubr.f32.gmra.mxu0 %v831_v9  ;;  %864 = vst [vmem:[#allocation10 + $0xf0] sm:$0xff] %v832_v15 }
 0x2bc   :  { %1557 = vmatprep.mubr.f32.mxu0 %v832_v15  ;;  %v833_v7 = vmul.f32 %v1663_v27, %v2069_v32 }
 0x2be   :  { %865 = vst [vmem:[#allocation10 + $0xf8] sm:$0xff] %v833_v7 }
 0x2bf   :  { %1558 = vmatmul.mubr.f32.gmra.mxu0 %v833_v7 }
 0x2c0   :  { %1755 = shalt.err (!%p1752_p10)
}
 0x2c1   :  { %1150 = dma.vmem_to_hbm [thread:$0]  %s1145_s22, 4096, %s2127_s6, [#allocation4], %s1796_s29, %s1796_s29, %s1797_s30  }
 0x2c2   :  { %s1801_s6 = smov [#allocation11]  }
 0x2c3   :  { %s1156_s26 = sshll.u32 %s1801_s6, 4  ;;  %s1157_s26 = int_to_ptr.vmem [resolvable:$true] %s1156_s26 }
 0x2c4   :  { %s1764_s27 = scalar_lea.vmem %s1157_s26, 4096  ;;  %p1769_p12 = scmp.lt.s32.totalorder %s1157_s26, %s1157_s26 }
 0x2c5   :  { %p1765_p11 = scmp.ne.s32.totalorder %s1157_s26, %s1764_s27  ;;  %p1770_p13 = scmp.lt.s32.totalorder %s1764_s27, %s1764_s27 }
 0x2c7   :  { %p1771_p0 = por %p1770_p13, %p1769_p12 }
 0x2c9   :  { %p1772_p1 = pnand %p1771_p0, %p1765_p11 }
 0x343   :  { %v1514_v17 = vpop.f32.mrf.mxu0 }
 0x344   :  { %1108 = vst [vmem:[#allocation11 + $0x8] sm:$0xff] %v1514_v17 }
 0x345   :  { %v948_v23 = vpop.f32.mrf.mxu0 }
 0x346   :  { %1107 = vst [vmem:[#allocation11] sm:$0xff] %v948_v23 }
 0x347   :  { %v1517_v25 = vpop.f32.mrf.mxu0 }
 0x348   :  { %1110 = vst [vmem:[#allocation11 + $0x18] sm:$0xff] %v1517_v25 }
 0x349   :  { %v958_v31 = vpop.f32.mrf.mxu0 }
 0x34a   :  { %1109 = vst [vmem:[#allocation11 + $0x10] sm:$0xff] %v958_v31 }
 0x34b   :  { %v1520_v32 = vpop.f32.mrf.mxu0 }
 0x34c   :  { %1112 = vst [vmem:[#allocation11 + $0x28] sm:$0xff] %v1520_v32 }
 0x34d   :  { %v968_v10 = vpop.f32.mrf.mxu0 }
 0x34e   :  { %1111 = vst [vmem:[#allocation11 + $0x20] sm:$0xff] %v968_v10 }
 0x34f   :  { %v1523_v29 = vpop.f32.mrf.mxu0 }
 0x350   :  { %1114 = vst [vmem:[#allocation11 + $0x38] sm:$0xff] %v1523_v29 }
 0x351   :  { %v978_v30 = vpop.f32.mrf.mxu0 }
 0x352   :  { %1113 = vst [vmem:[#allocation11 + $0x30] sm:$0xff] %v978_v30 }
 0x353   :  { %v1526_v42 = vpop.f32.mrf.mxu0 }
 0x354   :  { %1116 = vst [vmem:[#allocation11 + $0x48] sm:$0xff] %v1526_v42 }
 0x355   :  { %v988_v34 = vpop.f32.mrf.mxu0 }
 0x356   :  { %1115 = vst [vmem:[#allocation11 + $0x40] sm:$0xff] %v988_v34 }
 0x357   :  { %v1529_v35 = vpop.f32.mrf.mxu0 }
 0x358   :  { %1118 = vst [vmem:[#allocation11 + $0x58] sm:$0xff] %v1529_v35 }
 0x359   :  { %v998_v37 = vpop.f32.mrf.mxu0 }
 0x35a   :  { %1117 = vst [vmem:[#allocation11 + $0x50] sm:$0xff] %v998_v37 }
 0x35b   :  { %v1532_v12 = vpop.f32.mrf.mxu0 }
 0x35c   :  { %1120 = vst [vmem:[#allocation11 + $0x68] sm:$0xff] %v1532_v12 }
 0x35d   :  { %v1008_v18 = vpop.f32.mrf.mxu0 }
 0x35e   :  { %1119 = vst [vmem:[#allocation11 + $0x60] sm:$0xff] %v1008_v18 }
 0x35f   :  { %v1535_v38 = vpop.f32.mrf.mxu0 }
 0x360   :  { %1122 = vst [vmem:[#allocation11 + $0x78] sm:$0xff] %v1535_v38 }
 0x361   :  { %v1018_v0 = vpop.f32.mrf.mxu0 }
 0x362   :  { %1121 = vst [vmem:[#allocation11 + $0x70] sm:$0xff] %v1018_v0 }
 0x363   :  { %v1538_v39 = vpop.f32.mrf.mxu0 }
 0x364   :  { %1124 = vst [vmem:[#allocation11 + $0x88] sm:$0xff] %v1538_v39 }
 0x365   :  { %v1028_v47 = vpop.f32.mrf.mxu0 }
 0x366   :  { %1123 = vst [vmem:[#allocation11 + $0x80] sm:$0xff] %v1028_v47 }
 0x367   :  { %v1541_v44 = vpop.f32.mrf.mxu0 }
 0x368   :  { %1126 = vst [vmem:[#allocation11 + $0x98] sm:$0xff] %v1541_v44 }
 0x369   :  { %v1038_v43 = vpop.f32.mrf.mxu0 }
 0x36a   :  { %1125 = vst [vmem:[#allocation11 + $0x90] sm:$0xff] %v1038_v43 }
 0x36b   :  { %v1544_v21 = vpop.f32.mrf.mxu0 }
 0x36c   :  { %1128 = vst [vmem:[#allocation11 + $0xa8] sm:$0xff] %v1544_v21 }
 0x36d   :  { %v1048_v26 = vpop.f32.mrf.mxu0 }
 0x36e   :  { %1127 = vst [vmem:[#allocation11 + $0xa0] sm:$0xff] %v1048_v26 }
 0x36f   :  { %v1547_v46 = vpop.f32.mrf.mxu0 }
 0x370   :  { %1130 = vst [vmem:[#allocation11 + $0xb8] sm:$0xff] %v1547_v46 }
 0x371   :  { %v1058_v40 = vpop.f32.mrf.mxu0 }
 0x372   :  { %1129 = vst [vmem:[#allocation11 + $0xb0] sm:$0xff] %v1058_v40 }
 0x373   :  { %v1550_v48 = vpop.f32.mrf.mxu0 }
 0x374   :  { %1132 = vst [vmem:[#allocation11 + $0xc8] sm:$0xff] %v1550_v48 }
 0x375   :  { %v1068_v50 = vpop.f32.mrf.mxu0 }
 0x376   :  { %1131 = vst [vmem:[#allocation11 + $0xc0] sm:$0xff] %v1068_v50 }
 0x377   :  { %v1553_v51 = vpop.f32.mrf.mxu0 }
 0x378   :  { %1134 = vst [vmem:[#allocation11 + $0xd8] sm:$0xff] %v1553_v51 }
 0x379   :  { %v1078_v49 = vpop.f32.mrf.mxu0 }
 0x37a   :  { %1133 = vst [vmem:[#allocation11 + $0xd0] sm:$0xff] %v1078_v49 }
 0x37b   :  { %v1556_v28 = vpop.f32.mrf.mxu0 }
 0x37c   :  { %1136 = vst [vmem:[#allocation11 + $0xe8] sm:$0xff] %v1556_v28 }
 0x37d   :  { %v1088_v33 = vpop.f32.mrf.mxu0 }
 0x37e   :  { %1135 = vst [vmem:[#allocation11 + $0xe0] sm:$0xff] %v1088_v33 }
 0x37f   :  { %v1559_v53 = vpop.f32.mrf.mxu0 }
 0x380   :  { %1138 = vst [vmem:[#allocation11 + $0xf8] sm:$0xff] %v1559_v53 }
 0x381   :  { %v1098_v54 = vpop.f32.mrf.mxu0 }
 0x382   :  { %1137 = vst [vmem:[#allocation11 + $0xf0] sm:$0xff] %v1098_v54 }
 0x383   :  { %1775 = shalt.err (!%p1772_p1)
}
 0x384   :  { %1162 = dma.vmem_to_hbm [thread:$0]  %s1157_s26, 4096, %s2128_s7, [#allocation12], %s1796_s29, %s1796_s29, %s1797_s30  }
 0x385   :  { %1790 = dma.done.wait [#allocation4], 4096  }
 0x386   :  { %1791 = vsyncadd [#allocation4], 4294963200 }
 0x387   :  { %1792 = dma.done.wait [#allocation12], 4096  }
 0x388   :  { %1793 = vsyncadd [#allocation12], 4294963200 }
 0x389   :  { %1169 = vsyncpa [#allocation3], 1 }
 0x38a   :  { %1170 = vsyncpa [#allocation6], 1 }
 0x38b   :  { %1171 = vsyncpa [#allocation9], 1 }
 0x38c   :  { %1172 = vsyncpa [#allocation4], 1 }
 0x38d   :  { %1173 = vsyncpa [#allocation12], 1 }

</bundles_post_ra>
